<compile_context>
chip_gen: v5e
topology: v5e:2x2
jax: 0.10.0
libtpu: 0.0.40
codegen_flags: <defaults>
</compile_context>

<pallas_src>
from functools import partial

import jax
import jax.numpy as jnp
from jax import lax
from jax.experimental import pallas as pl
from jax.experimental.pallas import tpu as pltpu


def _round_up(x, m):
    return ((x + m - 1) // m) * m


def _pick_tile(n, d, itemsize, max_tile=256):
    """Tile size: full (8-aligned) when small, else a 128-multiple sized so a
    (tile, D) input block stays <= ~4 MiB (double-buffered operand streams +
    per-tile temporaries fit default scoped VMEM on v5e/v6e/v7x)."""
    if n <= max_tile:
        return _round_up(n, 8)
    t = max_tile
    while t > 128 and t * d * itemsize > 4 * (1 << 20):
        t //= 2
    return t


def _mmd_rbf_tile_kernel(coef_ref, a_ref, c_ref, rsq_ref, csq_ref, o_ref,
                         *, tile, batch, n, kernel_num):
    i = pl.program_id(0)   # row-tile index  ("parallel")
    j = pl.program_id(1)   # col-tile index  ("arbitrary", innermost reduction)

    @pl.when(j == 0)
    def _init():
        o_ref[...] = jnp.zeros_like(o_ref)

    # Gram tile on the MXU: contract on the feature (lane) axis of both
    # operands -- no transpose/relayout, native-dtype operands, f32 accumulate.
    gram = lax.dot_general(
        a_ref[...], c_ref[...],
        dimension_numbers=(((1,), (1,)), ((), ())),
        preferred_element_type=jnp.float32,
    )                                                       # (tile, tile)

    # Pairwise squared distances from precomputed row/col squared norms.
    l2 = rsq_ref[...] + csq_ref[...] - 2.0 * gram
    l2 = jnp.maximum(l2, 0.0)   # clamp tiny negative fp residue on the diagonal

    # Multi-bandwidth RBF ladder; coef_k = -1/(bw * kernel_mul**k) live in SMEM
    # (scalar prefetch) -> one scalar*matrix multiply + one exp per bandwidth.
    kern = jnp.exp(l2 * coef_ref[0])
    for k in range(1, kernel_num):
        kern = kern + jnp.exp(l2 * coef_ref[k])

    # Sign weights replace the four sliced block means:
    #   +1 for source rows, -1 for target rows, 0 for padding rows.
    r_idx = i * tile + lax.broadcasted_iota(jnp.int32, (tile, 1), 0)
    c_idx = j * tile + lax.broadcasted_iota(jnp.int32, (1, tile), 1)
    r_sgn = jnp.where(r_idx < batch, 1.0, jnp.where(r_idx < n, -1.0, 0.0))
    c_sgn = jnp.where(c_idx < batch, 1.0, jnp.where(c_idx < n, -1.0, 0.0))

    o_ref[...] += jnp.sum(kern * (r_sgn * c_sgn))


def mmd_loss_rbf(source, target, kernel_mul=2.0, kernel_num=5, fix_sigma=None,
                 max_tile=256):
    """MMD_loss(kernel_type='rbf') forward. source/target: (B, D)."""
    assert source.shape == target.shape and source.ndim == 2
    b, d = source.shape
    n = 2 * b
    total = jnp.concatenate([source, target], axis=0)       # (n, d), native dtype

    # O(n*d) wrapper-side scalars (XLA fuses these; no (n,n) work here):
    #   sum_{i,j} ||x_i - x_j||^2 = 2*n*sum_i ||x_i||^2 - 2*||sum_i x_i||^2
    t32 = total.astype(jnp.float32)
    row_sq = jnp.sum(t32 * t32, axis=1)                      # (n,)
    if fix_sigma is not None:
        bandwidth = jnp.float32(fix_sigma)
    else:
        col_sum = jnp.sum(t32, axis=0)
        l2_total = 2.0 * n * jnp.sum(row_sq) - 2.0 * jnp.dot(col_sum, col_sum)
        # NOTE: degenerate inputs (all rows identical) give bw=0 -> inf/nan,
        # identical to the PyTorch reference behaviour.
        bandwidth = l2_total / jnp.float32(n * n - n)
    bandwidth = bandwidth / jnp.float32(kernel_mul ** (kernel_num // 2))
    muls = jnp.asarray([float(kernel_mul) ** k for k in range(kernel_num)],
                       dtype=jnp.float32)
    coefs = -1.0 / (bandwidth * muls)                        # (kernel_num,) -> SMEM

    # Tiling / padding. Padded rows are zero and get sign weight 0 in-kernel,
    # so they contribute nothing to the loss.
    itemsize = jnp.dtype(total.dtype).itemsize
    t = _pick_tile(n, d, itemsize, max_tile)
    n_pad = _round_up(n, t)
    if n_pad != n:
        total = jnp.pad(total, ((0, n_pad - n), (0, 0)))
        row_sq = jnp.pad(row_sq, (0, n_pad - n))
    rsq = row_sq.reshape(n_pad, 1)
    csq = row_sq.reshape(1, n_pad)
    gi = n_pad // t

    kernel = partial(_mmd_rbf_tile_kernel, tile=t, batch=b, n=n,
                     kernel_num=int(kernel_num))

    partials = pl.pallas_call(
        kernel,
        out_shape=jax.ShapeDtypeStruct((gi, 1, 1), jnp.float32),
        grid_spec=pltpu.PrefetchScalarGridSpec(
            num_scalar_prefetch=1,                           # coefs -> SMEM
            grid=(gi, gi),
            in_specs=[
                pl.BlockSpec((t, d), lambda i, j, c: (i, 0)),   # row block of total
                pl.BlockSpec((t, d), lambda i, j, c: (j, 0)),   # col block of total
                pl.BlockSpec((t, 1), lambda i, j, c: (i, 0)),   # row sq-norms
                pl.BlockSpec((1, t), lambda i, j, c: (0, j)),   # col sq-norms
            ],
            out_specs=pl.BlockSpec((1, 1, 1), lambda i, j, c: (i, 0, 0)),
        ),
        compiler_params=pltpu.CompilerParams(
            dimension_semantics=("parallel", "arbitrary")),
    )(coefs, total, total, rsq, csq)

    return jnp.sum(partials) / jnp.float32(b * b)


def mmd_loss_linear(source, target):
    """MMD_loss(kernel_type='linear') forward: trivial O(n*d) reduction, plain JAX."""
    delta = (jnp.mean(source.astype(jnp.float32), axis=0)
             - jnp.mean(target.astype(jnp.float32), axis=0))
    return jnp.dot(delta, delta)


def _mmd_loss_rbf_ref(source, target, kernel_mul=2.0, kernel_num=5):
    """Pure-JAX reference mirroring the PyTorch module (sanity check)."""
    b = source.shape[0]
    total = jnp.concatenate([source, target], axis=0).astype(jnp.float32)
    n = total.shape[0]
    diff = total[None, :, :] - total[:, None, :]
    l2 = jnp.sum(diff * diff, axis=2)
    bw = jnp.sum(l2) / (n * n - n)
    bw = bw / (kernel_mul ** (kernel_num // 2))
    kern = sum(jnp.exp(-l2 / (bw * kernel_mul ** i)) for i in range(kernel_num))
    xx = jnp.mean(kern[:b, :b])
    yy = jnp.mean(kern[b:, b:])
    xy = jnp.mean(kern[:b, b:])
    yx = jnp.mean(kern[b:, :b])
    return xx + yy - xy - yx


if __name__ == "__main__":
    key = jax.random.PRNGKey(0)
    k1, k2 = jax.random.split(key)
    B, D = 8, 32
    source = jax.random.normal(k1, (B, D), dtype=jnp.float32)
    target = jax.random.normal(k2, (B, D), dtype=jnp.float32) + 0.5

    loss = jax.block_until_ready(mmd_loss_rbf(source, target))
    ref = _mmd_loss_rbf_ref(source, target)
    assert jnp.allclose(loss, ref, rtol=1e-4, atol=1e-5), (loss, ref)

    print("KERNEL_OK")
</pallas_src>

<mosaic_0001>
module attributes {stable_mosaic.version = 11 : i64} {
  func.func @_mmd_rbf_tile_kernel(%arg0: i32, %arg1: i32, %arg2: memref<5xf32, #tpu.memory_space<smem>>, %arg3: memref<16x32xf32, #tpu.memory_space<vmem>>, %arg4: memref<16x32xf32, #tpu.memory_space<vmem>>, %arg5: memref<16x1xf32, #tpu.memory_space<vmem>>, %arg6: memref<1x16xf32, #tpu.memory_space<vmem>>, %arg7: memref<1x1x1xf32, #tpu.memory_space<vmem>>) attributes {dimension_semantics = [#tpu.dimension_semantics<parallel>, #tpu.dimension_semantics<arbitrary>], iteration_bounds = array<i64: 1, 1>, scalar_prefetch = 1 : i64, scratch_operands = 0 : i64, tpu.core_type = #tpu.core_type<tc>, window_params = [{transform_indices = @transform_0, window_bounds = array<i64: 16, 32>}, {transform_indices = @transform_1, window_bounds = array<i64: 16, 32>}, {transform_indices = @transform_2, window_bounds = array<i64: 16, 1>}, {transform_indices = @transform_3, window_bounds = array<i64: 1, 16>}, {transform_indices = @transform_4, window_bounds = array<i64: 1, 1, 1>}]} {
    %c0_i32 = arith.constant 0 : i32
    %0 = arith.cmpi eq, %arg1, %c0_i32 : i32
    %1 = arith.extui %0 : i1 to i32
    %c0_i32_0 = arith.constant 0 : i32
    %2 = arith.cmpi ne, %1, %c0_i32_0 : i32
    scf.if %2 {
      %cst_28 = arith.constant 0.000000e+00 : f32
      %78 = vector.broadcast %cst_28 : f32 to vector<1x1x1xf32>
      %c0_29 = arith.constant 0 : index
      %c0_30 = arith.constant 0 : index
      %c0_31 = arith.constant 0 : index
      %79 = vector.load %arg7[%c0_29, %c0_30, %c0_31] : memref<1x1x1xf32, #tpu.memory_space<vmem>>, vector<1x1x1xf32>
      tpu.vector_store %arg7[%c0_29, %c0_30, %c0_31], %78 {strides = array<i32>} : memref<1x1x1xf32, #tpu.memory_space<vmem>>, vector<1x1x1xf32>,
    } else {
    }
    %c0 = arith.constant 0 : index
    %c0_1 = arith.constant 0 : index
    %3 = vector.load %arg3[%c0, %c0_1] : memref<16x32xf32, #tpu.memory_space<vmem>>, vector<16x32xf32>
    %c0_2 = arith.constant 0 : index
    %c0_3 = arith.constant 0 : index
    %4 = vector.load %arg4[%c0_2, %c0_3] : memref<16x32xf32, #tpu.memory_space<vmem>>, vector<16x32xf32>
    %cst = arith.constant dense<0.000000e+00> : vector<16x16xf32>
    %5 = tpu.matmul %3, %4, %cst {dimension_numbers = #tpu.dot_dimension_numbers<[1], [1], [0], [0], [0, 0, 1, 0], [], []>} : vector<16x32xf32>, vector<16x32xf32>, vector<16x16xf32> -> vector<16x16xf32>
    %c0_4 = arith.constant 0 : index
    %c0_5 = arith.constant 0 : index
    %6 = vector.load %arg5[%c0_4, %c0_5] : memref<16x1xf32, #tpu.memory_space<vmem>>, vector<16x1xf32>
    %c0_6 = arith.constant 0 : index
    %c0_7 = arith.constant 0 : index
    %7 = vector.load %arg6[%c0_6, %c0_7] : memref<1x16xf32, #tpu.memory_space<vmem>>, vector<1x16xf32>
    %8 = vector.broadcast %6 : vector<16x1xf32> to vector<16x16xf32>
    %9 = vector.broadcast %7 : vector<1x16xf32> to vector<16x16xf32>
    %10 = arith.addf %8, %9 : vector<16x16xf32>
    %cst_8 = arith.constant 2.000000e+00 : f32
    %11 = vector.broadcast %cst_8 : f32 to vector<16x16xf32>
    %12 = arith.mulf %11, %5 : vector<16x16xf32>
    %13 = arith.subf %10, %12 : vector<16x16xf32>
    %cst_9 = arith.constant 0.000000e+00 : f32
    %14 = vector.broadcast %cst_9 : f32 to vector<16x16xf32>
    %15 = arith.maximumf %13, %14 : vector<16x16xf32>
    %c0_10 = arith.constant 0 : index
    %16 = memref.load %arg2[%c0_10] : memref<5xf32, #tpu.memory_space<smem>>
    %17 = vector.broadcast %16 : f32 to vector<16x16xf32>
    %18 = arith.mulf %15, %17 : vector<16x16xf32>
    %19 = math.exp %18 : vector<16x16xf32>
    %c1 = arith.constant 1 : index
    %20 = memref.load %arg2[%c1] : memref<5xf32, #tpu.memory_space<smem>>
    %21 = vector.broadcast %20 : f32 to vector<16x16xf32>
    %22 = arith.mulf %15, %21 : vector<16x16xf32>
    %23 = math.exp %22 : vector<16x16xf32>
    %24 = arith.addf %19, %23 : vector<16x16xf32>
    %c2 = arith.constant 2 : index
    %25 = memref.load %arg2[%c2] : memref<5xf32, #tpu.memory_space<smem>>
    %26 = vector.broadcast %25 : f32 to vector<16x16xf32>
    %27 = arith.mulf %15, %26 : vector<16x16xf32>
    %28 = math.exp %27 : vector<16x16xf32>
    %29 = arith.addf %24, %28 : vector<16x16xf32>
    %c3 = arith.constant 3 : index
    %30 = memref.load %arg2[%c3] : memref<5xf32, #tpu.memory_space<smem>>
    %31 = vector.broadcast %30 : f32 to vector<16x16xf32>
    %32 = arith.mulf %15, %31 : vector<16x16xf32>
    %33 = math.exp %32 : vector<16x16xf32>
    %34 = arith.addf %29, %33 : vector<16x16xf32>
    %c4 = arith.constant 4 : index
    %35 = memref.load %arg2[%c4] : memref<5xf32, #tpu.memory_space<smem>>
    %36 = vector.broadcast %35 : f32 to vector<16x16xf32>
    %37 = arith.mulf %15, %36 : vector<16x16xf32>
    %38 = math.exp %37 : vector<16x16xf32>
    %39 = arith.addf %34, %38 : vector<16x16xf32>
    %c16_i32 = arith.constant 16 : i32
    %40 = arith.muli %arg0, %c16_i32 : i32
    %41 = tpu.iota {dimensions = array<i32: 0>} : vector<16x1xi32>
    %42 = vector.broadcast %40 : i32 to vector<16x1xi32>
    %43 = arith.addi %42, %41 : vector<16x1xi32>
    %c16_i32_11 = arith.constant 16 : i32
    %44 = arith.muli %arg1, %c16_i32_11 : i32
    %45 = tpu.iota {dimensions = array<i32: 1>} : vector<1x16xi32>
    %46 = vector.broadcast %44 : i32 to vector<1x16xi32>
    %47 = arith.addi %46, %45 : vector<1x16xi32>
    %c8_i32 = arith.constant 8 : i32
    %48 = vector.broadcast %c8_i32 : i32 to vector<16x1xi32>
    %49 = arith.cmpi slt, %43, %48 : vector<16x1xi32>
    %c16_i32_12 = arith.constant 16 : i32
    %50 = vector.broadcast %c16_i32_12 : i32 to vector<16x1xi32>
    %51 = arith.cmpi slt, %43, %50 : vector<16x1xi32>
    %cst_13 = arith.constant -1.000000e+00 : f32
    %cst_14 = arith.constant 0.000000e+00 : f32
    %52 = vector.broadcast %cst_13 : f32 to vector<16x1xf32>
    %53 = vector.broadcast %cst_14 : f32 to vector<16x1xf32>
    %54 = arith.select %51, %52, %53 : vector<16x1xi1>, vector<16x1xf32>
    %cst_15 = arith.constant 1.000000e+00 : f32
    %55 = vector.broadcast %cst_15 : f32 to vector<16x1xf32>
    %56 = arith.select %49, %55, %54 : vector<16x1xi1>, vector<16x1xf32>
    %c8_i32_16 = arith.constant 8 : i32
    %57 = vector.broadcast %c8_i32_16 : i32 to vector<1x16xi32>
    %58 = arith.cmpi slt, %47, %57 : vector<1x16xi32>
    %c16_i32_17 = arith.constant 16 : i32
    %59 = vector.broadcast %c16_i32_17 : i32 to vector<1x16xi32>
    %60 = arith.cmpi slt, %47, %59 : vector<1x16xi32>
    %cst_18 = arith.constant -1.000000e+00 : f32
    %cst_19 = arith.constant 0.000000e+00 : f32
    %61 = vector.broadcast %cst_18 : f32 to vector<1x16xf32>
    %62 = vector.broadcast %cst_19 : f32 to vector<1x16xf32>
    %63 = arith.select %60, %61, %62 : vector<1x16xi1>, vector<1x16xf32>
    %cst_20 = arith.constant 1.000000e+00 : f32
    %64 = vector.broadcast %cst_20 : f32 to vector<1x16xf32>
    %65 = arith.select %58, %64, %63 : vector<1x16xi1>, vector<1x16xf32>
    %c0_21 = arith.constant 0 : index
    %c0_22 = arith.constant 0 : index
    %c0_23 = arith.constant 0 : index
    %66 = vector.load %arg7[%c0_21, %c0_22, %c0_23] : memref<1x1x1xf32, #tpu.memory_space<vmem>>, vector<1x1x1xf32>
    %67 = vector.broadcast %56 : vector<16x1xf32> to vector<16x16xf32>
    %68 = vector.broadcast %65 : vector<1x16xf32> to vector<16x16xf32>
    %69 = arith.mulf %67, %68 : vector<16x16xf32>
    %70 = arith.mulf %39, %69 : vector<16x16xf32>
    %71 = vector.shape_cast %70 : vector<16x16xf32> to vector<1x16x16xf32>
    %cst_24 = arith.constant dense<0.000000e+00> : vector<1xf32>
    %72 = vector.multi_reduction <add>, %71, %cst_24 [1, 2] : vector<1x16x16xf32> to vector<1xf32>
    %73 = vector.shape_cast %72 : vector<1xf32> to vector<1x1x1xf32>
    %74 = vector.extract %73[0, 0, 0] : f32 from vector<1x1x1xf32>
    %75 = vector.broadcast %74 : f32 to vector<1x1x1xf32>
    %76 = arith.addf %66, %75 : vector<1x1x1xf32>
    %c0_25 = arith.constant 0 : index
    %c0_26 = arith.constant 0 : index
    %c0_27 = arith.constant 0 : index
    %77 = vector.load %arg7[%c0_25, %c0_26, %c0_27] : memref<1x1x1xf32, #tpu.memory_space<vmem>>, vector<1x1x1xf32>
    tpu.vector_store %arg7[%c0_25, %c0_26, %c0_27], %76 {strides = array<i32>} : memref<1x1x1xf32, #tpu.memory_space<vmem>>, vector<1x1x1xf32>,
    return
  }
  func.func @transform_0(%arg0: i32, %arg1: i32, %arg2: memref<5xf32, #tpu.memory_space<smem>>) -> (i32, i32) {
    %c0_i32 = arith.constant 0 : i32
    %c0_i32_0 = arith.constant 0 : i32
    return %arg0, %c0_i32 : i32, i32
  }
  func.func @transform_1(%arg0: i32, %arg1: i32, %arg2: memref<5xf32, #tpu.memory_space<smem>>) -> (i32, i32) {
    %c0_i32 = arith.constant 0 : i32
    %c0_i32_0 = arith.constant 0 : i32
    return %arg1, %c0_i32 : i32, i32
  }
  func.func @transform_2(%arg0: i32, %arg1: i32, %arg2: memref<5xf32, #tpu.memory_space<smem>>) -> (i32, i32) {
    %c0_i32 = arith.constant 0 : i32
    %c0_i32_0 = arith.constant 0 : i32
    return %arg0, %c0_i32 : i32, i32
  }
  func.func @transform_3(%arg0: i32, %arg1: i32, %arg2: memref<5xf32, #tpu.memory_space<smem>>) -> (i32, i32) {
    %c0_i32 = arith.constant 0 : i32
    %c0_i32_0 = arith.constant 0 : i32
    return %c0_i32, %arg1 : i32, i32
  }
  func.func @transform_4(%arg0: i32, %arg1: i32, %arg2: memref<5xf32, #tpu.memory_space<smem>>) -> (i32, i32, i32) {
    %c0_i32 = arith.constant 0 : i32
    %c0_i32_0 = arith.constant 0 : i32
    %c0_i32_1 = arith.constant 0 : i32
    return %arg0, %c0_i32, %c0_i32_0 : i32, i32, i32
  }
}

</mosaic_0001>

<bundles_post_ra>
// kernel: tpu_custom_call.1
= control target key start
LH: loop header
LB: loop body
LE: loop exit
PB: predicated region body
PF: predicated region fallthrough
CT: control target
= control target key end

     0   :  { %s331_s21 = smov [#allocation3]   ;;  %s399_s0 = inlined_call_operand.vmem [shape: f32[5], index: 0, kind: input, shape index: {}]   ;;  %s400_s1 = inlined_call_operand.vmem [shape: f32[16,32], index: 1, kind: input, shape index: {}]   ;;  %s401_s2 = inlined_call_operand.hbm [shape: f32[16,32], index: 2, kind: input, shape index: {}]   ;;  %s402_s3 = inlined_call_operand.vmem [shape: f32[16,1], index: 3, kind: input, shape index: {}]   ;;  %s403_s4 = inlined_call_operand.vmem [shape: f32[1,16], index: 4, kind: input, shape index: {}]   ;;  %s404_s5 = inlined_call_operand.hbm [shape: f32[1,1,1], index: 5, kind: output, shape index: {}]  }
   0x1   :  { %s11_s20 = sshll.u32 %s399_s0, 4  ;;  %s12_s20 = int_to_ptr.vmem [resolvable:$true] %s11_s20 }
   0x2   :  { %14 = dma.vmem_to_smem %s12_s20, 16, %s331_s21, [#allocation2] }
   0x3   :  { %325 = dma.done.wait [#allocation2], 16 }
   0x4   :  { %326 = vsyncadd [#allocation2], 4294967280 }
   0x5   :  { %17 = sfence }
   0x6   :  { %18 = vsyncpa [#allocation5], 0 }
   0x7   :  { %19 = vsyncpa [#allocation6], 0  ;;  %s26_s24 = sshll.u32 %s401_s2, 4  ;;  %s332_s25 = smov [#allocation4]   ;;  %s27_s24 = int_to_ptr.hbm [resolvable:$true] %s26_s24 }
   0x8   :  { %s28_s26 = sshll.u32 %s332_s25, 4  ;;  %s333_s27 = smov 128   ;;  %s29_s26 = int_to_ptr.vmem [resolvable:$true] %s28_s26 }
   0x9   :  { %s334_s28 = smov 8  }
   0xa   :  { %34 = dma.hbm_to_vmem [thread:$0]  %s27_s24, 256, %s29_s26, [#allocation5], %s333_s27, %s333_s27, %s334_s28  }
   0xb   :  { %327 = dma.done.wait [#allocation5], 256  }
   0xc   :  { %328 = vsyncadd [#allocation5], 4294967040  ;;  %v335_v0 = vmov 0   ;;  %vm53_vm0 = vcmask 261120   ;;  %v52_v1 = vld [vmem:[#allocation4 + $0x8] sm:$0xff]  ;;  %v89_v2 = vld [vmem:[%s402_s3] sm:$0xff]  ;;  %v169_v32 = vlaneseq }
   0xd   :  { %243 = vset.pattern.permute.xlu0 %v335_v0  ;;  %224 = vmatpush.xpose.msk.msra.mxu0 %vm53_vm0, %v52_v1  ;;  %v51_v3 = vld [vmem:[#allocation4] sm:$0xff]  ;;  %v50_v5 = vld [vmem:[%s400_s1 + $0x8] sm:$0xff]  ;;  %vm47_vm1 = vcmask 0   ;;  %v336_v7 = vmov 0.0   ;;  %s113_s10 = sld [smem:[#allocation3]]  ;;  %vm190_vm4 = vcmask 130048  }
   0xe   :  { %232 = vmatpush.xpose.msk.msra.mxu1 %vm53_vm0, %v52_v1  ;;  %94 = vperm.xlu0 %243, %v89_v2   ;;  %v49_v4 = vld [vmem:[%s400_s1] sm:$0xff]  ;;  %v90_v6 = vld [vmem:[%s402_s3 + $0x8] sm:$0xff]  ;;  %48 = vst.msk [vmem:[#allocation7] sm:$0x1] %vm47_vm1, %v336_v7  ;;  %s228_s11 = sld [smem:[#allocation3 + $0x1]]  ;;  %v170_v44 = vand.u32 127, %v169_v32 }
   0xf   :  { %s229_s12 = sld [smem:[#allocation3 + $0x2]]  ;;  %v244_v9 = vld [vmem:[%s403_s4] ss:$0 sm:$0xff]  ;;  %s337_s3 = smov [#allocation7]  }
  0x10   :  { %s230_s1 = sld [smem:[#allocation3 + $0x3]]  ;;  %vm182_vm2 = vcmp.lt.s32.totalorder %v170_v44, 16  ;;  %vm181_vm3 = vcmp.lt.s32.totalorder %v170_v44, 8  ;;  %s212_s4 = sshll.u32 %s337_s3, 4  ;;  %s213_s4 = int_to_ptr.vmem [resolvable:$true] %s212_s4 }
  0x11   :  { %225 = vmatpush.xpose.msk.msra.mxu0 %vm53_vm0, %v51_v3  ;;  %s391_s15 = sld [smem:[#allocation3 + $0x4]]  ;;  %v183_v53 = vsel %vm182_vm2, -1.0, %v336_v7  ;;  %s214_s18 = sshll.u32 %s404_s5, 4  ;;  %s215_s18 = int_to_ptr.hbm [resolvable:$true] %s214_s18 }
  0x12   :  { %233 = vmatpush.xpose.msk.msra.mxu1 %vm53_vm0, %v51_v3  ;;  %v184_v59 = vsel %vm181_vm3, 1.0, %v183_v53 }
  0x13   :  { %v114_v19 = vstv %s113_s10  ;;  %v187_v2 = vmul.f32 -1.0, %v184_v59 }
  0x14   :  { %226 = vmatmul.msk.f32.vlgmr.msra.gmra.mxu0 %vm53_vm0, %v49_v4  ;;  %v122_v20 = vstv %s228_s11 }
  0x15   :  { %227 = vmatmul.msk.f32.vlgmr.msra.gmra.mxu1 %vm53_vm0, %v50_v5  ;;  %v132_v21 = vstv %s229_s12 }
  0x16   :  { %99 = vperm.xlu0 %243, %v90_v6   ;;  %v142_v24 = vstv %s230_s1 }
  0x17   :  { %v152_v28 = vstv %s391_s15 }
  0x80   :  { %v95_v8 = vpop.permute.xlu0 %94 }
  0x81   :  { %v105_v13 = vadd.f32 %v244_v9, %v95_v8 }
  0x88   :  { %v100_v10 = vpop.permute.xlu0 %99 }
  0x89   :  { %v106_v14 = vadd.f32 %v244_v9, %v100_v10 }
  0x91   :  { %v83_v11 = vpop.f32.mrf.mxu0 }
  0x92   :  { %v86_v12 = vpop.f32.mrf.mxu1  ;;  %v107_v15 = vmul.f32 2.0, %v83_v11 }
  0x93   :  { %v108_v16 = vmul.f32 2.0, %v86_v12 }
  0x94   :  { %v109_v17 = vsub.f32 %v105_v13, %v107_v15 }
  0x95   :  { %v110_v18 = vsub.f32 %v106_v14, %v108_v16 }
  0x96   :  { %v111_v22 = vmax.f32 %v109_v17, 0.0  ;;  %v185_v17 = vld [vmem:[#allocation7] sm:$0x1] }
  0x97   :  { %v112_v23 = vmax.f32 %v110_v18, 0.0 }
  0x98   :  { %v115_v25 = vmul.f32 %v114_v19, %v111_v22  ;;  %v123_v26 = vmul.f32 %v122_v20, %v111_v22  ;;  %v133_v27 = vmul.f32 %v132_v21, %v111_v22  ;;  %v143_v36 = vmul.f32 %v142_v24, %v111_v22 }
  0x99   :  { %v116_v29 = vmul.f32 %v114_v19, %v112_v23  ;;  %v124_v30 = vmul.f32 %v122_v20, %v112_v23  ;;  %v134_v31 = vmul.f32 %v132_v21, %v112_v23  ;;  %v144_v38 = vmul.f32 %v142_v24, %v112_v23 }
  0x9a   :  { %v117_v33 = vmul.f32 1.442695, %v115_v25  ;;  %v125_v34 = vmul.f32 1.442695, %v123_v26  ;;  %v135_v35 = vmul.f32 1.442695, %v133_v27  ;;  %v153_v40 = vmul.f32 %v152_v28, %v111_v22 }
  0x9b   :  { %v119_v37 = vmul.f32 1.442695, %v116_v29  ;;  %v127_v39 = vmul.f32 1.442695, %v124_v30  ;;  %v137_v41 = vmul.f32 1.442695, %v134_v31  ;;  %v154_v43 = vmul.f32 %v152_v28, %v112_v23 }
  0x9c   :  { %245 = vpow2.f32 %v117_v33  ;;  %v145_v42 = vmul.f32 1.442695, %v143_v36  ;;  %v147_v45 = vmul.f32 1.442695, %v144_v38  ;;  %v155_v46 = vmul.f32 1.442695, %v153_v40 }
  0x9d   :  { %247 = vpow2.f32 %v125_v34  ;;  %v157_v48 = vmul.f32 1.442695, %v154_v43 }
  0x9e   :  { %249 = vpow2.f32 %v135_v35 }
  0x9f   :  { %251 = vpow2.f32 %v119_v37 }
  0xa0   :  { %253 = vpow2.f32 %v127_v39 }
  0xa1   :  { %255 = vpow2.f32 %v137_v41 }
  0xa2   :  { %v246_v47 = vpop.eup %245  ;;  %257 = vpow2.f32 %v145_v42 }
  0xa3   :  { %v248_v49 = vpop.eup %247  ;;  %259 = vpow2.f32 %v147_v45 }
  0xa4   :  { %v250_v50 = vpop.eup %249  ;;  %v129_v51 = vadd.f32 %v248_v49, %v246_v47  ;;  %261 = vpow2.f32 %v155_v46 }
  0xa5   :  { %v252_v52 = vpop.eup %251  ;;  %263 = vpow2.f32 %v157_v48 }
  0xa6   :  { %v254_v54 = vpop.eup %253  ;;  %v139_v55 = vadd.f32 %v250_v50, %v129_v51 }
  0xa7   :  { %v256_v56 = vpop.eup %255  ;;  %v130_v57 = vadd.f32 %v254_v54, %v252_v52 }
  0xa8   :  { %v258_v58 = vpop.eup %257 }
  0xa9   :  { %v260_v60 = vpop.eup %259  ;;  %v140_v61 = vadd.f32 %v256_v56, %v130_v57  ;;  %v149_v62 = vadd.f32 %v258_v58, %v139_v55 }
  0xaa   :  { %v262_v63 = vpop.eup %261 }
  0xab   :  { %v150_v0 = vadd.f32 %v260_v60, %v140_v61  ;;  %v159_v1 = vadd.f32 %v262_v63, %v149_v62  ;;  %v264_v3 = vpop.eup %263 }
  0xad   :  { %v160_v4 = vadd.f32 %v264_v3, %v150_v0  ;;  %v188_v5 = vmul.f32 %v184_v59, %v159_v1 }
  0xaf   :  { %v189_v6 = vmul.f32 %v187_v2, %v160_v4  ;;  %v191_v7 = vsel %vm190_vm4, %v188_v5, 0.0 }
  0xb1   :  { %v192_v8 = vsel %vm190_vm4, %v189_v6, 0.0 }
  0xb2   :  { %v193_v9 = vadd.f32 %v192_v8, %v191_v7 }
  0xb4   :  { %194 = vadd.xlane.f32.xlu1 %v193_v9 }
 0x127   :  { %v195_v10 = vpop.xlane.xlu1 %194 }
 0x128   :  { %v196_v11 = vrot.slane %v195_v10, 4 }
 0x12a   :  { %v197_v12 = vadd.f32 %v196_v11, %v195_v10 }
 0x12c   :  { %v198_v13 = vrot.slane %v197_v12, 2 }
 0x12e   :  { %v199_v14 = vadd.f32 %v198_v13, %v197_v12 }
 0x130   :  { %v200_v15 = vrot.slane %v199_v14, 1 }
 0x132   :  { %v201_v16 = vadd.f32 %v200_v15, %v199_v14 }
 0x134   :  { %234 = vpush %v201_v16 }
 0x165   :  { %s235_s19 = spop %234 }
 0x166   :  { %v203_v18 = vstv %s235_s19 }
 0x167   :  { %v204_v19 = vadd.f32 %v203_v18, %v185_v17 }
 0x169   :  { %206 = vst.msk [vmem:[#allocation7] sm:$0x1] %vm47_vm1, %v204_v19 }
 0x16a   :  { %217 = dma.vmem_to_hbm [thread:$0]  %s213_s4, 16, %s215_s18, [#allocation6]  }
 0x16b   :  { %329 = dma.done.wait [#allocation6], 16  }
 0x16c   :  { %330 = vsyncadd [#allocation6], 4294967280 }
 0x16d   :  { %222 = vsyncpa [#allocation5], 1 }
 0x16e   :  { %223 = vsyncpa [#allocation6], 1 }

</bundles_post_ra>
